<compile_context>
chip_gen: v7x
topology: tpu7x:2x2x1
jax: 0.10.0
libtpu: 0.0.40
codegen_flags: <defaults>
</compile_context>

<pallas_src>
import jax
import jax.numpy as jnp
from jax.experimental import pallas as pl
from jax.experimental.pallas import tpu as pltpu


def _round_up(x, m):
    return (x + m - 1) // m * m


def mlp_kernel(x_ref,
               w1_ref, b1_ref,
               w2_ref, b2_ref,
               w3_ref, b3_ref,
               w4_ref, b4_ref,
               w5_ref, b5_ref,
               o_ref):
    """Fused forward for one row tile."""
    x = x_ref[...]                      # (tm, in_dim) f32

    # Layer 1: K = in_dim is tiny -> VPU broadcast-FMA, skip the MXU entirely.
    w1 = w1_ref[...]                    # (in_dim, hidden) f32
    h = b1_ref[...]                     # (1, hidden) f32, broadcasts over rows
    for k in range(x.shape[1]):         # static unroll over tiny in_dim
        h = h + x[:, k:k + 1] * w1[k:k + 1, :]
    h = jnp.maximum(h, 0.0)

    # Layers 2-4: bf16 MXU matmuls, f32 accumulation; bias + ReLU stay f32.
    for w_ref, b_ref in ((w2_ref, b2_ref), (w3_ref, b3_ref), (w4_ref, b4_ref)):
        h = jnp.dot(h.astype(jnp.bfloat16), w_ref[...],
                    preferred_element_type=jnp.float32) + b_ref[...]
        h = jnp.maximum(h, 0.0)

    # Layer 5: output padded to 128 lanes -> lane-dense (unmasked) stores.
    y = jnp.dot(h.astype(jnp.bfloat16), w5_ref[...],
                preferred_element_type=jnp.float32) + b5_ref[...]
    o_ref[...] = y.astype(o_ref.dtype)


def mlp_forward(x, params, *, tile_m=512):
    """x: (B, in_dim) float32. params: list of 5 (W (in,out) f32, b (1,out) f32)."""
    B, in_dim = x.shape
    (w1, b1), (w2, b2), (w3, b3), (w4, b4), (w5, b5) = params
    hidden = w1.shape[1]
    out_dim = w5.shape[1]

    # ---- row tiling: big tiles, padded batch so every tile is full ----
    B_pad = _round_up(B, 8)                 # sublane alignment
    tm = min(tile_m, B_pad)                 # toy batches -> single grid step
    B_pad = _round_up(B_pad, tm)
    if B_pad != B:
        x = jnp.pad(x, ((0, B_pad - B), (0, 0)))
    grid = (B_pad // tm,)

    # ---- lane-dense output: pad out_dim up to 128 lanes, slice afterwards ----
    out_pad = _round_up(max(out_dim, 128), 128)
    w5p = jnp.pad(w5, ((0, 0), (0, out_pad - out_dim)))
    b5p = jnp.pad(b5, ((0, 0), (0, out_pad - out_dim)))

    # ---- dtype prep: bf16 weights on the MXU path; layer-1 weight / biases f32 ----
    w2b = w2.astype(jnp.bfloat16)
    w3b = w3.astype(jnp.bfloat16)
    w4b = w4.astype(jnp.bfloat16)
    w5b = w5p.astype(jnp.bfloat16)

    def full_spec(shape):
        # whole parameter resident in VMEM for every grid step (constant block index)
        return pl.BlockSpec(shape, lambda i: (0, 0))

    in_specs = [
        pl.BlockSpec((tm, in_dim), lambda i: (i, 0)),   # x row tile
        full_spec(w1.shape), full_spec(b1.shape),
        full_spec(w2b.shape), full_spec(b2.shape),
        full_spec(w3b.shape), full_spec(b3.shape),
        full_spec(w4b.shape), full_spec(b4.shape),
        full_spec(w5b.shape), full_spec(b5p.shape),
    ]
    out_spec = pl.BlockSpec((tm, out_pad), lambda i: (i, 0))

    flops = 2 * B_pad * (in_dim * hidden + 3 * hidden * hidden + hidden * out_pad)
    bytes_accessed = (
        x.size * 4 + B_pad * out_pad * 4
        + w1.size * 4 + w2b.size * 2 + w3b.size * 2 + w4b.size * 2 + w5b.size * 2
        + (b1.size + b2.size + b3.size + b4.size + b5p.size) * 4
    )

    y = pl.pallas_call(
        mlp_kernel,
        out_shape=jax.ShapeDtypeStruct((B_pad, out_pad), x.dtype),
        grid_spec=pltpu.PrefetchScalarGridSpec(
            num_scalar_prefetch=0,
            grid=grid,
            in_specs=in_specs,
            out_specs=out_spec,
        ),
        compiler_params=pltpu.CompilerParams(
            dimension_semantics=("parallel",),   # row tiles are independent (feeds both v7x TCs)
        ),
        cost_estimate=pl.CostEstimate(
            flops=flops, transcendentals=0, bytes_accessed=bytes_accessed),
    )(x, w1, b1, w2b, b2, w3b, b3, w4b, b4, w5b, b5p)

    return y[:B, :out_dim]


def init_params(key, in_dim=2, hidden_dim=256, out_dim=1):
    """Deterministic init mimicking PyTorch Linear default U[-1/sqrt(fan_in), +...].
    Weights already transposed to (in, out); biases as (1, out)."""
    dims = [(in_dim, hidden_dim),
            (hidden_dim, hidden_dim),
            (hidden_dim, hidden_dim),
            (hidden_dim, hidden_dim),
            (hidden_dim, out_dim)]
    params = []
    for (fan_in, fan_out) in dims:
        key, kw, kb = jax.random.split(key, 3)
        bound = 1.0 / jnp.sqrt(jnp.float32(fan_in))
        w_t = jax.random.uniform(kw, (fan_in, fan_out), jnp.float32, -bound, bound)
        b = jax.random.uniform(kb, (1, fan_out), jnp.float32, -bound, bound)
        params.append((w_t, b))
    return params


def mlp_reference(x, params):
    h = x
    for i, (w, b) in enumerate(params):
        h = h @ w + b
        if i < len(params) - 1:
            h = jnp.maximum(h, 0.0)
    return h


if __name__ == "__main__":
    key = jax.random.PRNGKey(0)
    key, kx = jax.random.split(key)

    B, in_dim, hidden_dim, out_dim = 16, 2, 256, 1
    x = jax.random.normal(kx, (B, in_dim), jnp.float32)
    params = init_params(key, in_dim, hidden_dim, out_dim)

    y = mlp_forward(x, params)            # B=16 -> whole batch in a single grid step
    y = jax.block_until_ready(y)

    y_ref = mlp_reference(x, params)
    assert y.shape == (B, out_dim)
    max_err = float(jnp.max(jnp.abs(y - y_ref)))
    # bf16 MXU path with f32 accumulation -> loosened tolerance vs f32 reference.
    assert jnp.allclose(y, y_ref, atol=1e-2, rtol=1e-2), f"mismatch vs reference (max err {max_err})"

    print("KERNEL_OK")
</pallas_src>

<mosaic_0001>
module attributes {stable_mosaic.version = 11 : i64} {
  func.func @mlp_kernel(%arg0: i32, %arg1: memref<16x2xf32, #tpu.memory_space<vmem>>, %arg2: memref<2x256xf32, #tpu.memory_space<vmem>>, %arg3: memref<1x256xf32, #tpu.memory_space<vmem>>, %arg4: memref<256x256xbf16, #tpu.memory_space<vmem>>, %arg5: memref<1x256xf32, #tpu.memory_space<vmem>>, %arg6: memref<256x256xbf16, #tpu.memory_space<vmem>>, %arg7: memref<1x256xf32, #tpu.memory_space<vmem>>, %arg8: memref<256x256xbf16, #tpu.memory_space<vmem>>, %arg9: memref<1x256xf32, #tpu.memory_space<vmem>>, %arg10: memref<256x128xbf16, #tpu.memory_space<vmem>>, %arg11: memref<1x128xf32, #tpu.memory_space<vmem>>, %arg12: memref<16x128xf32, #tpu.memory_space<vmem>>) attributes {dimension_semantics = [#tpu.dimension_semantics<parallel>], iteration_bounds = array<i64: 1>, scalar_prefetch = 0 : i64, scratch_operands = 0 : i64, tpu.core_type = #tpu.core_type<tc>, window_params = [{transform_indices = @transform_0, window_bounds = array<i64: 16, 2>}, {pipeline_mode = #tpu.pipeline_mode<synchronous>, transform_indices = @transform_1, window_bounds = array<i64: 2, 256>}, {pipeline_mode = #tpu.pipeline_mode<synchronous>, transform_indices = @transform_2, window_bounds = array<i64: 1, 256>}, {pipeline_mode = #tpu.pipeline_mode<synchronous>, transform_indices = @transform_3, window_bounds = array<i64: 256, 256>}, {pipeline_mode = #tpu.pipeline_mode<synchronous>, transform_indices = @transform_4, window_bounds = array<i64: 1, 256>}, {pipeline_mode = #tpu.pipeline_mode<synchronous>, transform_indices = @transform_5, window_bounds = array<i64: 256, 256>}, {pipeline_mode = #tpu.pipeline_mode<synchronous>, transform_indices = @transform_6, window_bounds = array<i64: 1, 256>}, {pipeline_mode = #tpu.pipeline_mode<synchronous>, transform_indices = @transform_7, window_bounds = array<i64: 256, 256>}, {pipeline_mode = #tpu.pipeline_mode<synchronous>, transform_indices = @transform_8, window_bounds = array<i64: 1, 256>}, {pipeline_mode = #tpu.pipeline_mode<synchronous>, transform_indices = @transform_9, window_bounds = array<i64: 256, 128>}, {pipeline_mode = #tpu.pipeline_mode<synchronous>, transform_indices = @transform_10, window_bounds = array<i64: 1, 128>}, {transform_indices = @transform_11, window_bounds = array<i64: 16, 128>}]} {
    %c0 = arith.constant 0 : index
    %c0_0 = arith.constant 0 : index
    %0 = vector.load %arg1[%c0, %c0_0] : memref<16x2xf32, #tpu.memory_space<vmem>>, vector<16x2xf32>
    %c0_1 = arith.constant 0 : index
    %c0_2 = arith.constant 0 : index
    %1 = vector.load %arg2[%c0_1, %c0_2] : memref<2x256xf32, #tpu.memory_space<vmem>>, vector<2x256xf32>
    %c0_3 = arith.constant 0 : index
    %c0_4 = arith.constant 0 : index
    %2 = vector.load %arg3[%c0_3, %c0_4] : memref<1x256xf32, #tpu.memory_space<vmem>>, vector<1x256xf32>
    %3 = vector.extract_strided_slice %0 {offsets = [0, 0], sizes = [16, 1], strides = [1, 1]} : vector<16x2xf32> to vector<16x1xf32>
    %4 = vector.extract_strided_slice %1 {offsets = [0, 0], sizes = [1, 256], strides = [1, 1]} : vector<2x256xf32> to vector<1x256xf32>
    %5 = vector.broadcast %3 : vector<16x1xf32> to vector<16x256xf32>
    %6 = vector.broadcast %4 : vector<1x256xf32> to vector<16x256xf32>
    %7 = arith.mulf %5, %6 : vector<16x256xf32>
    %8 = vector.broadcast %2 : vector<1x256xf32> to vector<16x256xf32>
    %9 = arith.addf %8, %7 : vector<16x256xf32>
    %10 = vector.extract_strided_slice %0 {offsets = [0, 1], sizes = [16, 1], strides = [1, 1]} : vector<16x2xf32> to vector<16x1xf32>
    %11 = vector.extract_strided_slice %1 {offsets = [1, 0], sizes = [1, 256], strides = [1, 1]} : vector<2x256xf32> to vector<1x256xf32>
    %12 = vector.broadcast %10 : vector<16x1xf32> to vector<16x256xf32>
    %13 = vector.broadcast %11 : vector<1x256xf32> to vector<16x256xf32>
    %14 = arith.mulf %12, %13 : vector<16x256xf32>
    %15 = arith.addf %9, %14 : vector<16x256xf32>
    %cst = arith.constant 0.000000e+00 : f32
    %16 = vector.broadcast %cst : f32 to vector<16x256xf32>
    %17 = arith.maximumf %15, %16 : vector<16x256xf32>
    %18 = arith.truncf %17 : vector<16x256xf32> to vector<16x256xbf16>
    %c0_5 = arith.constant 0 : index
    %c0_6 = arith.constant 0 : index
    %19 = vector.load %arg4[%c0_5, %c0_6] : memref<256x256xbf16, #tpu.memory_space<vmem>>, vector<256x256xbf16>
    %cst_7 = arith.constant dense<0.000000e+00> : vector<16x256xf32>
    %20 = tpu.matmul %18, %19, %cst_7 {dimension_numbers = #tpu.dot_dimension_numbers<[1], [0], [0], [1], [0, 0, 1, 1], [], []>} : vector<16x256xbf16>, vector<256x256xbf16>, vector<16x256xf32> -> vector<16x256xf32>
    %c0_8 = arith.constant 0 : index
    %c0_9 = arith.constant 0 : index
    %21 = vector.load %arg5[%c0_8, %c0_9] : memref<1x256xf32, #tpu.memory_space<vmem>>, vector<1x256xf32>
    %22 = vector.broadcast %21 : vector<1x256xf32> to vector<16x256xf32>
    %23 = arith.addf %20, %22 : vector<16x256xf32>
    %cst_10 = arith.constant 0.000000e+00 : f32
    %24 = vector.broadcast %cst_10 : f32 to vector<16x256xf32>
    %25 = arith.maximumf %23, %24 : vector<16x256xf32>
    %26 = arith.truncf %25 : vector<16x256xf32> to vector<16x256xbf16>
    %c0_11 = arith.constant 0 : index
    %c0_12 = arith.constant 0 : index
    %27 = vector.load %arg6[%c0_11, %c0_12] : memref<256x256xbf16, #tpu.memory_space<vmem>>, vector<256x256xbf16>
    %cst_13 = arith.constant dense<0.000000e+00> : vector<16x256xf32>
    %28 = tpu.matmul %26, %27, %cst_13 {dimension_numbers = #tpu.dot_dimension_numbers<[1], [0], [0], [1], [0, 0, 1, 1], [], []>} : vector<16x256xbf16>, vector<256x256xbf16>, vector<16x256xf32> -> vector<16x256xf32>
    %c0_14 = arith.constant 0 : index
    %c0_15 = arith.constant 0 : index
    %29 = vector.load %arg7[%c0_14, %c0_15] : memref<1x256xf32, #tpu.memory_space<vmem>>, vector<1x256xf32>
    %30 = vector.broadcast %29 : vector<1x256xf32> to vector<16x256xf32>
    %31 = arith.addf %28, %30 : vector<16x256xf32>
    %cst_16 = arith.constant 0.000000e+00 : f32
    %32 = vector.broadcast %cst_16 : f32 to vector<16x256xf32>
    %33 = arith.maximumf %31, %32 : vector<16x256xf32>
    %34 = arith.truncf %33 : vector<16x256xf32> to vector<16x256xbf16>
    %c0_17 = arith.constant 0 : index
    %c0_18 = arith.constant 0 : index
    %35 = vector.load %arg8[%c0_17, %c0_18] : memref<256x256xbf16, #tpu.memory_space<vmem>>, vector<256x256xbf16>
    %cst_19 = arith.constant dense<0.000000e+00> : vector<16x256xf32>
    %36 = tpu.matmul %34, %35, %cst_19 {dimension_numbers = #tpu.dot_dimension_numbers<[1], [0], [0], [1], [0, 0, 1, 1], [], []>} : vector<16x256xbf16>, vector<256x256xbf16>, vector<16x256xf32> -> vector<16x256xf32>
    %c0_20 = arith.constant 0 : index
    %c0_21 = arith.constant 0 : index
    %37 = vector.load %arg9[%c0_20, %c0_21] : memref<1x256xf32, #tpu.memory_space<vmem>>, vector<1x256xf32>
    %38 = vector.broadcast %37 : vector<1x256xf32> to vector<16x256xf32>
    %39 = arith.addf %36, %38 : vector<16x256xf32>
    %cst_22 = arith.constant 0.000000e+00 : f32
    %40 = vector.broadcast %cst_22 : f32 to vector<16x256xf32>
    %41 = arith.maximumf %39, %40 : vector<16x256xf32>
    %42 = arith.truncf %41 : vector<16x256xf32> to vector<16x256xbf16>
    %c0_23 = arith.constant 0 : index
    %c0_24 = arith.constant 0 : index
    %43 = vector.load %arg10[%c0_23, %c0_24] : memref<256x128xbf16, #tpu.memory_space<vmem>>, vector<256x128xbf16>
    %cst_25 = arith.constant dense<0.000000e+00> : vector<16x128xf32>
    %44 = tpu.matmul %42, %43, %cst_25 {dimension_numbers = #tpu.dot_dimension_numbers<[1], [0], [0], [1], [0, 0, 1, 1], [], []>} : vector<16x256xbf16>, vector<256x128xbf16>, vector<16x128xf32> -> vector<16x128xf32>
    %c0_26 = arith.constant 0 : index
    %c0_27 = arith.constant 0 : index
    %45 = vector.load %arg11[%c0_26, %c0_27] : memref<1x128xf32, #tpu.memory_space<vmem>>, vector<1x128xf32>
    %46 = vector.broadcast %45 : vector<1x128xf32> to vector<16x128xf32>
    %47 = arith.addf %44, %46 : vector<16x128xf32>
    %c0_28 = arith.constant 0 : index
    %c0_29 = arith.constant 0 : index
    %48 = vector.load %arg12[%c0_28, %c0_29] : memref<16x128xf32, #tpu.memory_space<vmem>>, vector<16x128xf32>
    tpu.vector_store %arg12[%c0_28, %c0_29], %47 {strides = array<i32>} : memref<16x128xf32, #tpu.memory_space<vmem>>, vector<16x128xf32>,
    return
  }
  func.func @transform_0(%arg0: i32) -> (i32, i32) {
    %c0_i32 = arith.constant 0 : i32
    %c0_i32_0 = arith.constant 0 : i32
    return %arg0, %c0_i32 : i32, i32
  }
  func.func @transform_1(%arg0: i32) -> (i32, i32) {
    %c0_i32 = arith.constant 0 : i32
    %c0_i32_0 = arith.constant 0 : i32
    %c0_i32_1 = arith.constant 0 : i32
    return %c0_i32, %c0_i32_0 : i32, i32
  }
  func.func @transform_2(%arg0: i32) -> (i32, i32) {
    %c0_i32 = arith.constant 0 : i32
    %c0_i32_0 = arith.constant 0 : i32
    %c0_i32_1 = arith.constant 0 : i32
    return %c0_i32, %c0_i32_0 : i32, i32
  }
  func.func @transform_3(%arg0: i32) -> (i32, i32) {
    %c0_i32 = arith.constant 0 : i32
    %c0_i32_0 = arith.constant 0 : i32
    %c0_i32_1 = arith.constant 0 : i32
    return %c0_i32, %c0_i32_0 : i32, i32
  }
  func.func @transform_4(%arg0: i32) -> (i32, i32) {
    %c0_i32 = arith.constant 0 : i32
    %c0_i32_0 = arith.constant 0 : i32
    %c0_i32_1 = arith.constant 0 : i32
    return %c0_i32, %c0_i32_0 : i32, i32
  }
  func.func @transform_5(%arg0: i32) -> (i32, i32) {
    %c0_i32 = arith.constant 0 : i32
    %c0_i32_0 = arith.constant 0 : i32
    %c0_i32_1 = arith.constant 0 : i32
    return %c0_i32, %c0_i32_0 : i32, i32
  }
  func.func @transform_6(%arg0: i32) -> (i32, i32) {
    %c0_i32 = arith.constant 0 : i32
    %c0_i32_0 = arith.constant 0 : i32
    %c0_i32_1 = arith.constant 0 : i32
    return %c0_i32, %c0_i32_0 : i32, i32
  }
  func.func @transform_7(%arg0: i32) -> (i32, i32) {
    %c0_i32 = arith.constant 0 : i32
    %c0_i32_0 = arith.constant 0 : i32
    %c0_i32_1 = arith.constant 0 : i32
    return %c0_i32, %c0_i32_0 : i32, i32
  }
  func.func @transform_8(%arg0: i32) -> (i32, i32) {
    %c0_i32 = arith.constant 0 : i32
    %c0_i32_0 = arith.constant 0 : i32
    %c0_i32_1 = arith.constant 0 : i32
    return %c0_i32, %c0_i32_0 : i32, i32
  }
  func.func @transform_9(%arg0: i32) -> (i32, i32) {
    %c0_i32 = arith.constant 0 : i32
    %c0_i32_0 = arith.constant 0 : i32
    %c0_i32_1 = arith.constant 0 : i32
    return %c0_i32, %c0_i32_0 : i32, i32
  }
  func.func @transform_10(%arg0: i32) -> (i32, i32) {
    %c0_i32 = arith.constant 0 : i32
    %c0_i32_0 = arith.constant 0 : i32
    %c0_i32_1 = arith.constant 0 : i32
    return %c0_i32, %c0_i32_0 : i32, i32
  }
  func.func @transform_11(%arg0: i32) -> (i32, i32) {
    %c0_i32 = arith.constant 0 : i32
    %c0_i32_0 = arith.constant 0 : i32
    return %arg0, %c0_i32 : i32, i32
  }
}

</mosaic_0001>

<bundles_post_ra>
// kernel: tpu_custom_call.1
= control target key start
LH: loop header
LB: loop body
LE: loop exit
PB: predicated region body
PF: predicated region fallthrough
CT: control target
= control target key end

     0   :  { %16 = vsyncpa [#allocation3], 0  ;;  %s1769_s0 = inlined_call_operand.vmem [shape: f32[16,2], index: 0, kind: input, shape index: {}]   ;;  %s1770_s1 = inlined_call_operand.vmem [shape: f32[2,256], index: 1, kind: input, shape index: {}]   ;;  %s1771_s2 = inlined_call_operand.vmem [shape: f32[1,256], index: 2, kind: input, shape index: {}]   ;;  %s1772_s3 = inlined_call_operand.hbm [shape: bf16[256,256], index: 3, kind: input, shape index: {}]   ;;  %s1773_s4 = inlined_call_operand.vmem [shape: f32[1,256], index: 4, kind: input, shape index: {}]   ;;  %s1774_s5 = inlined_call_operand.hbm [shape: bf16[256,256], index: 5, kind: input, shape index: {}]   ;;  %s1775_s6 = inlined_call_operand.vmem [shape: f32[1,256], index: 6, kind: input, shape index: {}]   ;;  %s1776_s7 = inlined_call_operand.hbm [shape: bf16[256,256], index: 7, kind: input, shape index: {}]   ;;  %s1777_s8 = inlined_call_operand.vmem [shape: f32[1,256], index: 8, kind: input, shape index: {}]   ;;  %s1778_s9 = inlined_call_operand.hbm [shape: bf16[256,128], index: 9, kind: input, shape index: {}]   ;;  %s1779_s10 = inlined_call_operand.vmem [shape: f32[1,128], index: 10, kind: input, shape index: {}]   ;;  %s1780_s11 = inlined_call_operand.hbm [shape: f32[16,128], index: 11, kind: output, shape index: {}]  }
   0x1   :  { %17 = vsyncpa [#allocation6], 0 }
   0x2   :  { %18 = vsyncpa [#allocation9], 0 }
   0x3   :  { %19 = vsyncpa [#allocation4], 0  ;;  %s1570_s17 = smov [#allocation5]   ;;  %s1571_s19 = smov [#allocation2]  }
   0x4   :  { %s45_s18 = sshll.u32 %s1570_s17, 4  ;;  %s31_s20 = sshll.u32 %s1571_s19, 4  ;;  %s46_s18 = int_to_ptr.vmem [resolvable:$true] %s45_s18  ;;  %s1641_s20 = int_to_ptr.vmem [resolvable:$true] %s31_s20 }
   0x5   :  { %s1452_s23 = scalar_lea.hbm %s1774_s5, 4096 }
   0x6   :  { %p1453_p0 = scmp.ne.s32.totalorder %s1774_s5, %s1452_s23  ;;  %p1456_p1 = scmp.lt.u32.totalorder %s1452_s23, %s1774_s5 }
   0x8   :  { %p1458_p2 = pnand %p1456_p1, %p1453_p0 }
   0xa   :  { %1461 = shalt.err (!%p1458_p2)
}
   0xb   :  { %s1462_s28 = scalar_lea.vmem %s46_s18, 4096  ;;  %p1467_p4 = scmp.lt.s32.totalorder %s46_s18, %s46_s18 }
   0xc   :  { %p1463_p3 = scmp.ne.s32.totalorder %s46_s18, %s1462_s28  ;;  %p1468_p5 = scmp.lt.s32.totalorder %s1462_s28, %s1462_s28 }
   0xe   :  { %p1469_p6 = por %p1468_p5, %p1467_p4 }
  0x10   :  { %p1470_p7 = pnand %p1469_p6, %p1463_p3 }
  0x12   :  { %1473 = shalt.err (!%p1470_p7)
}
  0x13   :  { %s1572_s29 = smov 128   ;;  %s1573_s30 = smov 8  }
  0x14   :  { %51 = dma.hbm_to_vmem [thread:$0]  %s1774_s5, 4096, %s46_s18, [#allocation6], %s1572_s29, %s1572_s29, %s1573_s30  }
  0x15   :  { %s1474_s16 = scalar_lea.hbm %s1772_s3, 4096 }
  0x16   :  { %p1475_p8 = scmp.ne.s32.totalorder %s1772_s3, %s1474_s16  ;;  %p1478_p9 = scmp.lt.u32.totalorder %s1474_s16, %s1772_s3 }
  0x18   :  { %p1480_p10 = pnand %p1478_p9, %p1475_p8 }
  0x1a   :  { %1483 = shalt.err (!%p1480_p10)
}
  0x1b   :  { %s1484_s23 = scalar_lea.vmem %s1641_s20, 4096  ;;  %p1489_p12 = scmp.lt.s32.totalorder %s1641_s20, %s1641_s20 }
  0x1c   :  { %p1485_p11 = scmp.ne.s32.totalorder %s1641_s20, %s1484_s23  ;;  %p1490_p13 = scmp.lt.s32.totalorder %s1484_s23, %s1484_s23 }
  0x1e   :  { %p1491_p0 = por %p1490_p13, %p1489_p12 }
  0x20   :  { %p1492_p1 = pnand %p1491_p0, %p1485_p11 }
  0x22   :  { %1495 = shalt.err (!%p1492_p1)
}
  0x23   :  { %37 = dma.hbm_to_vmem [thread:$0]  %s1772_s3, 4096, %s1641_s20, [#allocation3], %s1572_s29, %s1572_s29, %s1573_s30  }
  0x24   :  { %s1574_s24 = smov [#allocation7]   ;;  %s1575_s26 = smov [#allocation8]  }
  0x25   :  { %s59_s25 = sshll.u32 %s1574_s24, 4  ;;  %s73_s27 = sshll.u32 %s1575_s26, 4  ;;  %s60_s25 = int_to_ptr.vmem [resolvable:$true] %s59_s25  ;;  %s1678_s27 = int_to_ptr.vmem [resolvable:$true] %s73_s27 }
  0x26   :  { %s1496_s13 = scalar_lea.hbm %s1776_s7, 4096 }
  0x27   :  { %p1497_p2 = scmp.ne.s32.totalorder %s1776_s7, %s1496_s13  ;;  %p1500_p3 = scmp.lt.u32.totalorder %s1496_s13, %s1776_s7 }
  0x29   :  { %p1502_p4 = pnand %p1500_p3, %p1497_p2 }
  0x2b   :  { %1505 = shalt.err (!%p1502_p4)
}
  0x2c   :  { %s1506_s3 = scalar_lea.vmem %s60_s25, 4096  ;;  %p1511_p6 = scmp.lt.s32.totalorder %s60_s25, %s60_s25 }
  0x2d   :  { %p1507_p5 = scmp.ne.s32.totalorder %s60_s25, %s1506_s3  ;;  %p1512_p7 = scmp.lt.s32.totalorder %s1506_s3, %s1506_s3 }
  0x2f   :  { %p1513_p8 = por %p1512_p7, %p1511_p6 }
  0x31   :  { %p1514_p9 = pnand %p1513_p8, %p1507_p5 }
  0x33   :  { %1517 = shalt.err (!%p1514_p9)
}
  0x34   :  { %65 = dma.hbm_to_vmem [thread:$0]  %s1776_s7, 4096, %s60_s25, [#allocation6], %s1572_s29, %s1572_s29, %s1573_s30  }
  0x35   :  { %s1518_s23 = scalar_lea.hbm %s1778_s9, 2048 }
  0x36   :  { %p1519_p10 = scmp.ne.s32.totalorder %s1778_s9, %s1518_s23  ;;  %p1522_p11 = scmp.lt.u32.totalorder %s1518_s23, %s1778_s9 }
  0x38   :  { %p1524_p12 = pnand %p1522_p11, %p1519_p10 }
  0x3a   :  { %1527 = shalt.err (!%p1524_p12)
}
  0x3b   :  { %s1528_s28 = scalar_lea.vmem %s1678_s27, 2048  ;;  %p1533_p0 = scmp.lt.s32.totalorder %s1678_s27, %s1678_s27 }
  0x3c   :  { %p1529_p13 = scmp.ne.s32.totalorder %s1678_s27, %s1528_s28  ;;  %p1534_p1 = scmp.lt.s32.totalorder %s1528_s28, %s1528_s28 }
  0x3e   :  { %p1535_p2 = por %p1534_p1, %p1533_p0 }
  0x40   :  { %p1536_p3 = pnand %p1535_p2, %p1529_p13 }
  0x42   :  { %1539 = shalt.err (!%p1536_p3)
}
  0x43   :  { %s1576_s7 = smov 64   ;;  %s1577_s25 = smov 4  }
  0x44   :  { %79 = dma.hbm_to_vmem [thread:$0]  %s1778_s9, 2048, %s1678_s27, [#allocation9], %s1576_s7, %s1576_s7, %s1577_s25  }
  0x45   :  { %1562 = dma.done.wait [#allocation3], 4096  }
  0x46   :  { %1563 = vsyncadd [#allocation3], 4294963200 }
  0x47   :  { %1564 = dma.done.wait [#allocation6], 8192  }
  0x48   :  { %1565 = vsyncadd [#allocation6], 4294959104 }
  0x49   :  { %1566 = dma.done.wait [#allocation9], 2048  }
  0x4a   :  { %1567 = vsyncadd [#allocation9], 4294965248  ;;  %v1578_v0 = vmov 1   ;;  %v1579_v1 = vmov 0   ;;  %v95_v2 = vld [vmem:[%s1769_s0] sm:$0xff]  ;;  %v96_v3 = vld [vmem:[%s1769_s0 + $0x8] sm:$0xff]  ;;  %v110_v63 = vlaneseq }
  0x4b   :  { %1290 = vset.pattern.permute.xlu1 %v1578_v0  ;;  %1289 = vset.pattern.permute.xlu0 %v1579_v1  ;;  %v1292_v4 = vld [vmem:[#allocation2 + $0x4] ss:$8 sps:$4 sm:$0xff]   ;;  %v1294_v5 = vld [vmem:[#allocation2] ss:$8 sps:$4 sm:$0xff]   ;;  %v1295_v6 = vld [vmem:[#allocation2 + $0x14] ss:$8 sps:$4 sm:$0xff]  }
  0x4c   :  { %148 = vperm.xlu1 %1290, %v95_v2   ;;  %101 = vperm.xlu0 %1289, %v95_v2   ;;  %v1297_v7 = vld [vmem:[#allocation2 + $0x10] ss:$8 sps:$4 sm:$0xff]   ;;  %v1298_v8 = vld [vmem:[#allocation2 + $0x24] ss:$8 sps:$4 sm:$0xff]   ;;  %v1300_v9 = vld [vmem:[#allocation2 + $0x20] ss:$8 sps:$4 sm:$0xff]  }
  0x4d   :  { %391 = vmatprep.subr.bf16.mxu0 %v1292_v4  ;;  %v1301_v10 = vld [vmem:[#allocation2 + $0x34] ss:$8 sps:$4 sm:$0xff]   ;;  %v1303_v11 = vld [vmem:[#allocation2 + $0x30] ss:$8 sps:$4 sm:$0xff]   ;;  %v1304_v12 = vld [vmem:[#allocation2 + $0x44] ss:$8 sps:$4 sm:$0xff]  }
  0x4e   :  { %392 = vmatpush1.bf16.msra.mxu0 %v1294_v5  ;;  %v1306_v13 = vld [vmem:[#allocation2 + $0x40] ss:$8 sps:$4 sm:$0xff]   ;;  %v1307_v14 = vld [vmem:[#allocation2 + $0x54] ss:$8 sps:$4 sm:$0xff]   ;;  %v1309_v15 = vld [vmem:[#allocation2 + $0x50] ss:$8 sps:$4 sm:$0xff]  }
  0x4f   :  { %393 = vmatprep.subr.bf16.mxu0 %v1295_v6  ;;  %v1310_v16 = vld [vmem:[#allocation2 + $0x64] ss:$8 sps:$4 sm:$0xff]   ;;  %v1312_v17 = vld [vmem:[#allocation2 + $0x60] ss:$8 sps:$4 sm:$0xff]   ;;  %v1343_v20 = vld [vmem:[#allocation5 + $0x14] ss:$8 sps:$4 sm:$0xff]  }
  0x50   :  { %152 = vperm.xlu1 %1290, %v96_v3   ;;  %106 = vperm.xlu0 %1289, %v96_v3   ;;  %v1340_v18 = vld [vmem:[#allocation5 + $0x4] ss:$8 sps:$4 sm:$0xff]   ;;  %v1342_v19 = vld [vmem:[#allocation5] ss:$8 sps:$4 sm:$0xff]   ;;  %v1313_v21 = vld [vmem:[#allocation2 + $0x74] ss:$8 sps:$4 sm:$0xff]  }
  0x51   :  { %644 = vmatprep.subr.bf16.mxu1 %v1340_v18  ;;  %v1345_v22 = vld [vmem:[#allocation5 + $0x10] ss:$8 sps:$4 sm:$0xff]   ;;  %v1346_v23 = vld [vmem:[#allocation5 + $0x24] ss:$8 sps:$4 sm:$0xff]   ;;  %v1348_v26 = vld [vmem:[#allocation5 + $0x20] ss:$8 sps:$4 sm:$0xff]  }
  0x52   :  { %394 = vmatpush1.bf16.msra.mxu0 %v1297_v7  ;;  %645 = vmatpush1.bf16.msra.mxu1 %v1342_v19  ;;  %v1315_v24 = vld [vmem:[#allocation2 + $0x70] ss:$8 sps:$4 sm:$0xff]   ;;  %v1316_v25 = vld [vmem:[#allocation2 + $0x84] ss:$8 sps:$4 sm:$0xff]   ;;  %v1349_v27 = vld [vmem:[#allocation5 + $0x34] ss:$8 sps:$4 sm:$0xff]  }
  0x53   :  { %395 = vmatprep.subr.bf16.mxu0 %v1298_v8  ;;  %646 = vmatprep.subr.bf16.mxu1 %v1343_v20  ;;  %v1318_v28 = vld [vmem:[#allocation2 + $0x80] ss:$8 sps:$4 sm:$0xff]   ;;  %v1319_v29 = vld [vmem:[#allocation2 + $0x94] ss:$8 sps:$4 sm:$0xff]   ;;  %v1351_v30 = vld [vmem:[#allocation5 + $0x30] ss:$8 sps:$4 sm:$0xff]  }
  0x54   :  { %1291 = vset.pattern.permute.xlu0 %v1578_v0  ;;  %v1352_v31 = vld [vmem:[#allocation5 + $0x44] ss:$8 sps:$4 sm:$0xff]   ;;  %v1321_v32 = vld [vmem:[#allocation2 + $0x90] ss:$8 sps:$4 sm:$0xff]   ;;  %v1324_v34 = vld [vmem:[#allocation2 + $0xa0] ss:$8 sps:$4 sm:$0xff]  }
  0x55   :  { %v1322_v33 = vld [vmem:[#allocation2 + $0xa4] ss:$8 sps:$4 sm:$0xff]   ;;  %v1354_v35 = vld [vmem:[#allocation5 + $0x40] ss:$8 sps:$4 sm:$0xff]   ;;  %v1325_v36 = vld [vmem:[#allocation2 + $0xb4] ss:$8 sps:$4 sm:$0xff]  }
  0x56   :  { %396 = vmatpush1.bf16.msra.mxu0 %v1300_v9  ;;  %647 = vmatpush1.bf16.msra.mxu1 %v1345_v22  ;;  %v1355_v37 = vld [vmem:[#allocation5 + $0x54] ss:$8 sps:$4 sm:$0xff]   ;;  %v1357_v38 = vld [vmem:[#allocation5 + $0x50] ss:$8 sps:$4 sm:$0xff]   ;;  %v1358_v39 = vld [vmem:[#allocation5 + $0x64] ss:$8 sps:$4 sm:$0xff]  }
  0x57   :  { %397 = vmatprep.subr.bf16.mxu0 %v1301_v10  ;;  %648 = vmatprep.subr.bf16.mxu1 %v1346_v23  ;;  %v1327_v40 = vld [vmem:[#allocation2 + $0xb0] ss:$8 sps:$4 sm:$0xff]   ;;  %v1328_v41 = vld [vmem:[#allocation2 + $0xc4] ss:$8 sps:$4 sm:$0xff]   ;;  %v1360_v42 = vld [vmem:[#allocation5 + $0x60] ss:$8 sps:$4 sm:$0xff]  }
  0x58   :  { %v1361_v43 = vld [vmem:[#allocation5 + $0x74] ss:$8 sps:$4 sm:$0xff]   ;;  %v1330_v44 = vld [vmem:[#allocation2 + $0xc0] ss:$8 sps:$4 sm:$0xff]   ;;  %v1363_v46 = vld [vmem:[#allocation5 + $0x70] ss:$8 sps:$4 sm:$0xff]  }
  0x59   :  { %v1331_v45 = vld [vmem:[#allocation2 + $0xd4] ss:$8 sps:$4 sm:$0xff]   ;;  %v1364_v47 = vld [vmem:[#allocation5 + $0x84] ss:$8 sps:$4 sm:$0xff]   ;;  %v1333_v48 = vld [vmem:[#allocation2 + $0xd0] ss:$8 sps:$4 sm:$0xff]  }
  0x5a   :  { %398 = vmatpush1.bf16.msra.mxu0 %v1303_v11  ;;  %649 = vmatpush1.bf16.msra.mxu1 %v1348_v26  ;;  %v1334_v49 = vld [vmem:[#allocation2 + $0xe4] ss:$8 sps:$4 sm:$0xff]   ;;  %v1366_v50 = vld [vmem:[#allocation5 + $0x80] ss:$8 sps:$4 sm:$0xff]   ;;  %v1367_v51 = vld [vmem:[#allocation5 + $0x94] ss:$8 sps:$4 sm:$0xff]  }
  0x5b   :  { %399 = vmatprep.subr.bf16.mxu0 %v1304_v12  ;;  %650 = vmatprep.subr.bf16.mxu1 %v1349_v27  ;;  %v1336_v52 = vld [vmem:[#allocation2 + $0xe0] ss:$8 sps:$4 sm:$0xff]   ;;  %v1337_v53 = vld [vmem:[#allocation2 + $0xf4] ss:$8 sps:$4 sm:$0xff]   ;;  %v1369_v54 = vld [vmem:[#allocation5 + $0x90] ss:$8 sps:$4 sm:$0xff]  }
  0x5c   :  { %v1370_v55 = vld [vmem:[#allocation5 + $0xa4] ss:$8 sps:$4 sm:$0xff]   ;;  %v1339_v56 = vld [vmem:[#allocation2 + $0xf0] ss:$8 sps:$4 sm:$0xff]   ;;  %v1372_v57 = vld [vmem:[#allocation5 + $0xa0] ss:$8 sps:$4 sm:$0xff]  }
  0x5d   :  { %v1373_v58 = vld [vmem:[#allocation5 + $0xb4] ss:$8 sps:$4 sm:$0xff]   ;;  %v1375_v59 = vld [vmem:[#allocation5 + $0xb0] ss:$8 sps:$4 sm:$0xff]   ;;  %v1376_v60 = vld [vmem:[#allocation5 + $0xc4] ss:$8 sps:$4 sm:$0xff]  }
  0x5e   :  { %400 = vmatpush1.bf16.msra.mxu0 %v1306_v13  ;;  %651 = vmatpush1.bf16.msra.mxu1 %v1351_v30  ;;  %v1378_v61 = vld [vmem:[#allocation5 + $0xc0] ss:$8 sps:$4 sm:$0xff]   ;;  %v1379_v62 = vld [vmem:[#allocation5 + $0xd4] ss:$8 sps:$4 sm:$0xff]   ;;  %v111_v0 = vshrl.u32 %v110_v63, 7  ;;  %s1580_s22 = smov [#allocation10]  }
  0x5f   :  { %401 = vmatprep.subr.bf16.mxu0 %v1307_v14  ;;  %652 = vmatprep.subr.bf16.mxu1 %v1352_v31  ;;  %v97_v3 = vld [vmem:[%s1770_s1] sm:$0xf]  ;;  %v1409_v63 = vld [vmem:[#allocation7 + $0x70] ss:$8 sps:$4 sm:$0xff]   ;;  %s1129_s23 = sshll.u32 %s1580_s22, 4  ;;  %s1130_s23 = int_to_ptr.vmem [resolvable:$true] %s1129_s23 }
  0x60   :  { %v1718_v1 = vsub.s32 0, %v111_v0  ;;  %v116_v2 = vsub.s32 2, %v111_v0  ;;  %v1723_v4 = vsub.s32 1, %v111_v0  ;;  %v161_v5 = vsub.s32 3, %v111_v0  ;;  %v98_v10 = vld [vmem:[%s1771_s2] sm:$0x3]  ;;  %p1545_p5 = scmp.lt.s32.totalorder %s1130_s23, %s1130_s23 }
  0x61   :  { %v1414_v0 = vld [vmem:[#allocation7 + $0x84] ss:$8 sps:$4 sm:$0xff]   ;;  %s1540_s5 = scalar_lea.vmem %s1130_s23, 256 }
  0x62   :  { %402 = vmatpush1.bf16.msra.mxu0 %v1309_v15  ;;  %653 = vmatpush1.bf16.msra.mxu1 %v1354_v35  ;;  %v113_v6 = vrot.slane %v97_v3, %v1718_v1  ;;  %v117_v7 = vrot.slane %v97_v3, %v116_v2  ;;  %v158_v8 = vrot.slane %v97_v3, %v1723_v4  ;;  %v1412_v2 = vld [vmem:[#allocation7 + $0x80] ss:$8 sps:$4 sm:$0xff]   ;;  %p1541_p4 = scmp.ne.s32.totalorder %s1130_s23, %s1540_s5  ;;  %p1546_p6 = scmp.lt.s32.totalorder %s1540_s5, %s1540_s5 }
  0x63   :  { %403 = vmatprep.subr.bf16.mxu0 %v1310_v16  ;;  %654 = vmatprep.subr.bf16.mxu1 %v1355_v37  ;;  %v162_v9 = vrot.slane %v97_v3, %v161_v5  ;;  %v136_v14 = vrot.slane %v98_v10, %v1718_v1  ;;  %v1417_v3 = vld [vmem:[#allocation7 + $0x94] ss:$8 sps:$4 sm:$0xff]   ;;  %v1415_v5 = vld [vmem:[#allocation7 + $0x90] ss:$8 sps:$4 sm:$0xff]  }
  0x64   :  { %v123_v11 = vrot.slane %v113_v6, %v1718_v1  ;;  %v127_v12 = vrot.slane %v117_v7, %v1718_v1  ;;  %v168_v13 = vrot.slane %v158_v8, %v1723_v4  ;;  %v1420_v6 = vld [vmem:[#allocation7 + $0xa4] ss:$8 sps:$4 sm:$0xff]   ;;  %v1418_v7 = vld [vmem:[#allocation7 + $0xa0] ss:$8 sps:$4 sm:$0xff]   ;;  %v1423_v8 = vld [vmem:[#allocation7 + $0xb4] ss:$8 sps:$4 sm:$0xff]   ;;  %p1547_p7 = por %p1546_p6, %p1545_p5 }
  0x65   :  { %v172_v15 = vrot.slane %v162_v9, %v1723_v4  ;;  %v1421_v9 = vld [vmem:[#allocation7 + $0xb0] ss:$8 sps:$4 sm:$0xff]  }
  0x66   :  { %404 = vmatpush1.bf16.msra.mxu0 %v1312_v17  ;;  %655 = vmatpush1.bf16.msra.mxu1 %v1357_v38  ;;  %v140_v17 = vrot.slane %v98_v10, %v1723_v4  ;;  %v1426_v10 = vld [vmem:[#allocation7 + $0xc4] ss:$8 sps:$4 sm:$0xff]   ;;  %p1548_p8 = pnand %p1547_p7, %p1541_p4 }
  0x67   :  { %405 = vmatprep.subr.bf16.mxu0 %v1313_v21  ;;  %656 = vmatprep.subr.bf16.mxu1 %v1358_v39 }
  0x6a   :  { %406 = vmatpush1.bf16.msra.mxu0 %v1315_v24  ;;  %657 = vmatpush1.bf16.msra.mxu1 %v1360_v42 }
  0x6b   :  { %407 = vmatprep.subr.bf16.mxu0 %v1316_v25  ;;  %658 = vmatprep.subr.bf16.mxu1 %v1361_v43  ;;  %v1381_v43 = vld [vmem:[#allocation5 + $0xd0] ss:$8 sps:$4 sm:$0xff]  }
  0x6e   :  { %408 = vmatpush1.bf16.msra.mxu0 %v1318_v28  ;;  %659 = vmatpush1.bf16.msra.mxu1 %v1363_v46  ;;  %v1385_v46 = vld [vmem:[#allocation5 + $0xf4] ss:$8 sps:$4 sm:$0xff]  }
  0x6f   :  { %409 = vmatprep.subr.bf16.mxu0 %v1319_v29  ;;  %660 = vmatprep.subr.bf16.mxu1 %v1364_v47  ;;  %v1387_v47 = vld [vmem:[#allocation5 + $0xf0] ss:$8 sps:$4 sm:$0xff]  }
  0x72   :  { %410 = vmatpush1.bf16.msra.mxu0 %v1321_v32  ;;  %661 = vmatpush1.bf16.msra.mxu1 %v1366_v50  ;;  %v1393_v50 = vld [vmem:[#allocation7 + $0x14] ss:$8 sps:$4 sm:$0xff]  }
  0x73   :  { %411 = vmatprep.subr.bf16.mxu0 %v1322_v33  ;;  %662 = vmatprep.subr.bf16.mxu1 %v1367_v51  ;;  %v1391_v51 = vld [vmem:[#allocation7 + $0x10] ss:$8 sps:$4 sm:$0xff]  }
  0x76   :  { %412 = vmatpush1.bf16.msra.mxu0 %v1324_v34  ;;  %663 = vmatpush1.bf16.msra.mxu1 %v1369_v54  ;;  %v1399_v54 = vld [vmem:[#allocation7 + $0x34] ss:$8 sps:$4 sm:$0xff]  }
  0x77   :  { %413 = vmatprep.subr.bf16.mxu0 %v1325_v36  ;;  %664 = vmatprep.subr.bf16.mxu1 %v1370_v55  ;;  %v1397_v55 = vld [vmem:[#allocation7 + $0x30] ss:$8 sps:$4 sm:$0xff]  }
  0x7a   :  { %414 = vmatpush1.bf16.msra.mxu0 %v1327_v40  ;;  %665 = vmatpush1.bf16.msra.mxu1 %v1372_v57  ;;  %v1400_v57 = vld [vmem:[#allocation7 + $0x40] ss:$8 sps:$4 sm:$0xff]  }
  0x7b   :  { %415 = vmatprep.subr.bf16.mxu0 %v1328_v41  ;;  %666 = vmatprep.subr.bf16.mxu1 %v1373_v58  ;;  %v1405_v58 = vld [vmem:[#allocation7 + $0x54] ss:$8 sps:$4 sm:$0xff]  }
  0x7e   :  { %416 = vmatpush1.bf16.msra.mxu0 %v1330_v44  ;;  %667 = vmatpush1.bf16.msra.mxu1 %v1375_v59  ;;  %v1382_v44 = vld [vmem:[#allocation5 + $0xe4] ss:$8 sps:$4 sm:$0xff]   ;;  %v1403_v59 = vld [vmem:[#allocation7 + $0x50] ss:$8 sps:$4 sm:$0xff]  }
  0x7f   :  { %417 = vmatprep.subr.bf16.mxu0 %v1331_v45  ;;  %668 = vmatprep.subr.bf16.mxu1 %v1376_v60  ;;  %v1384_v45 = vld [vmem:[#allocation5 + $0xe0] ss:$8 sps:$4 sm:$0xff]   ;;  %v1408_v60 = vld [vmem:[#allocation7 + $0x64] ss:$8 sps:$4 sm:$0xff]  }
  0x82   :  { %418 = vmatpush1.bf16.msra.mxu0 %v1333_v48  ;;  %669 = vmatpush1.bf16.msra.mxu1 %v1378_v61  ;;  %v1388_v48 = vld [vmem:[#allocation7] ss:$8 sps:$4 sm:$0xff]  }
  0x83   :  { %419 = vmatprep.subr.bf16.mxu0 %v1334_v49  ;;  %670 = vmatprep.subr.bf16.mxu1 %v1379_v62  ;;  %v1390_v49 = vld [vmem:[#allocation7 + $0x4] ss:$8 sps:$4 sm:$0xff]   ;;  %v1406_v61 = vld [vmem:[#allocation7 + $0x60] ss:$8 sps:$4 sm:$0xff]   ;;  %v1411_v62 = vld [vmem:[#allocation7 + $0x74] ss:$8 sps:$4 sm:$0xff]  }
  0x86   :  { %420 = vmatpush1.bf16.msra.mxu0 %v1336_v52  ;;  %671 = vmatpush1.bf16.msra.mxu1 %v1381_v43  ;;  %v1396_v52 = vld [vmem:[#allocation7 + $0x24] ss:$8 sps:$4 sm:$0xff]  }
  0x87   :  { %421 = vmatprep.subr.bf16.mxu0 %v1337_v53  ;;  %672 = vmatprep.subr.bf16.mxu1 %v1382_v44  ;;  %v1394_v53 = vld [vmem:[#allocation7 + $0x20] ss:$8 sps:$4 sm:$0xff]  }
  0x88   :  { %v1444_v43 = vld [vmem:[#allocation8 + $0x60] sm:$0xff]  }
  0x89   :  { %v1445_v44 = vld [vmem:[#allocation8 + $0x20] sm:$0xff]  }
  0x8a   :  { %422 = vmatpush1.bf16.msra.mxu0 %v1339_v56  ;;  %673 = vmatpush1.bf16.msra.mxu1 %v1384_v45  ;;  %v1402_v56 = vld [vmem:[#allocation7 + $0x44] ss:$8 sps:$4 sm:$0xff]  }
  0x8b   :  { %674 = vmatprep.subr.bf16.mxu1 %v1385_v46  ;;  %897 = vmatprep.subr.bf16.mxu0 %v1390_v49  ;;  %v1446_v45 = vld [vmem:[#allocation8 + $0x68] sm:$0xff]  }
  0x8c   :  { %v472_v46 = vld [vmem:[%s1775_s6] sm:$0x3] }
  0x8e   :  { %675 = vmatpush1.bf16.msra.mxu1 %v1387_v47  ;;  %v477_v47 = vrot.slane %v472_v46, %v1718_v1 }
  0xcb   :  { %v149_v16 = vpop.permute.xlu1 %148  ;;  %v102_v18 = vpop.permute.xlu0 %101 }
  0xcc   :  { %v128_v19 = vmul.f32 %v123_v11, %v102_v18  ;;  %v129_v20 = vmul.f32 %v127_v12, %v102_v18  ;;  %v173_v21 = vmul.f32 %v168_v13, %v149_v16  ;;  %v174_v23 = vmul.f32 %v172_v15, %v149_v16 }
  0xce   :  { %v143_v22 = vadd.f32 %v136_v14, %v128_v19  ;;  %v144_v24 = vadd.f32 %v140_v17, %v129_v20 }
  0xcf   :  { %v153_v25 = vpop.permute.xlu1 %152  ;;  %v107_v26 = vpop.permute.xlu0 %106 }
  0xd0   :  { %v130_v27 = vmul.f32 %v123_v11, %v107_v26  ;;  %v131_v28 = vmul.f32 %v127_v12, %v107_v26  ;;  %v177_v29 = vadd.f32 %v173_v21, %v143_v22  ;;  %v175_v30 = vmul.f32 %v168_v13, %v153_v25  ;;  %v1424_v11 = vld [vmem:[#allocation7 + $0xc0] ss:$8 sps:$4 sm:$0xff]   ;;  %v1429_v12 = vld [vmem:[#allocation7 + $0xd4] ss:$8 sps:$4 sm:$0xff]   ;;  %v1427_v13 = vld [vmem:[#allocation7 + $0xd0] ss:$8 sps:$4 sm:$0xff]  }
  0xd1   :  { %v176_v32 = vmul.f32 %v172_v15, %v153_v25  ;;  %v178_v34 = vadd.f32 %v174_v23, %v144_v24 }
  0xd2   :  { %v145_v31 = vadd.f32 %v136_v14, %v130_v27  ;;  %v146_v33 = vadd.f32 %v140_v17, %v131_v28  ;;  %v181_v38 = vmax.f32 %v177_v29, 0.0  ;;  %v219_v14 = vld [vmem:[%s1773_s4] sm:$0x3] }
  0xd3   :  { %v182_v39 = vmax.f32 %v178_v34, 0.0  ;;  %v224_v15 = vrot.slane %v219_v14, %v1718_v1  ;;  %v228_v16 = vrot.slane %v219_v14, %v1723_v4  ;;  %v1433_v34 = vld [vmem:[#allocation7 + $0xf0] ss:$8 sps:$4 sm:$0xff]  }
  0xd4   :  { %v179_v35 = vadd.f32 %v175_v30, %v145_v31  ;;  %v180_v36 = vadd.f32 %v176_v32, %v146_v33  ;;  %v1432_v31 = vld [vmem:[#allocation7 + $0xe4] ss:$8 sps:$4 sm:$0xff]   ;;  %v1430_v32 = vld [vmem:[#allocation7 + $0xe0] ss:$8 sps:$4 sm:$0xff]   ;;  %v1435_v33 = vld [vmem:[#allocation7 + $0xf4] ss:$8 sps:$4 sm:$0xff]  }
  0xd6   :  { %v183_v37 = vmax.f32 %v179_v35, 0.0  ;;  %v184_v40 = vmax.f32 %v180_v36, 0.0  ;;  %v1436_v35 = vld [vmem:[#allocation8 + $0x40] sm:$0xff]  }
  0xd7   :  { %v1437_v36 = vld [vmem:[#allocation8] sm:$0xff]   ;;  %1256 = vmatprep.subr.bf16.mxu1 %v1436_v35 }
  0xd8   :  { %v185_v41 = vpack.c.bf16 %v183_v37, %v181_v38  ;;  %v186_v42 = vpack.c.bf16 %v184_v40, %v182_v39  ;;  %v1438_v37 = vld [vmem:[#allocation8 + $0x48] sm:$0xff]   ;;  %v1440_v39 = vld [vmem:[#allocation8 + $0x50] sm:$0xff]  }
  0xd9   :  { %v1439_v38 = vld [vmem:[#allocation8 + $0x8] sm:$0xff]   ;;  %v1441_v40 = vld [vmem:[#allocation8 + $0x10] sm:$0xff]  }
  0xda   :  { %423 = vmatprep.mubr.bf16.mxu0 %v186_v42  ;;  %v1443_v42 = vld [vmem:[#allocation8 + $0x18] sm:$0xff]  }
  0xdb   :  { %424 = vmatmul.mubr.bf16.vlgmr.msra.gmra.mrb[0].mxu0 %v185_v41  ;;  %v1442_v41 = vld [vmem:[#allocation8 + $0x58] sm:$0xff]  }
  0xdc   :  { %898 = vmatpush1.bf16.msra.mxu0 %v1388_v48  ;;  %v481_v48 = vrot.slane %v472_v46, %v1723_v4 }
  0xdd   :  { %899 = vmatprep.subr.bf16.mxu0 %v1393_v50 }
  0xe0   :  { %900 = vmatpush1.bf16.msra.mxu0 %v1391_v51 }
  0xe1   :  { %901 = vmatprep.subr.bf16.mxu0 %v1396_v52 }
  0xe4   :  { %902 = vmatpush1.bf16.msra.mxu0 %v1394_v53 }
  0xe5   :  { %903 = vmatprep.subr.bf16.mxu0 %v1399_v54 }
  0xe8   :  { %904 = vmatpush1.bf16.msra.mxu0 %v1397_v55 }
  0xe9   :  { %905 = vmatprep.subr.bf16.mxu0 %v1402_v56 }
  0xec   :  { %906 = vmatpush1.bf16.msra.mxu0 %v1400_v57 }
  0xed   :  { %907 = vmatprep.subr.bf16.mxu0 %v1405_v58 }
  0xf0   :  { %908 = vmatpush1.bf16.msra.mxu0 %v1403_v59 }
  0xf1   :  { %909 = vmatprep.subr.bf16.mxu0 %v1408_v60 }
  0xf4   :  { %910 = vmatpush1.bf16.msra.mxu0 %v1406_v61 }
  0xf5   :  { %911 = vmatprep.subr.bf16.mxu0 %v1411_v62 }
  0xf8   :  { %912 = vmatpush1.bf16.msra.mxu0 %v1409_v63  ;;  %v1447_v63 = vld [vmem:[#allocation8 + $0x28] sm:$0xff]  }
  0xf9   :  { %913 = vmatprep.subr.bf16.mxu0 %v1414_v0  ;;  %v1448_v0 = vld [vmem:[#allocation8 + $0x70] sm:$0xff]  }
  0xfc   :  { %914 = vmatpush1.bf16.msra.mxu0 %v1412_v2  ;;  %v1449_v2 = vld [vmem:[#allocation8 + $0x30] sm:$0xff]  }
  0xfd   :  { %915 = vmatprep.subr.bf16.mxu0 %v1417_v3  ;;  %v1450_v3 = vld [vmem:[#allocation8 + $0x78] sm:$0xff]  }
 0x100   :  { %916 = vmatpush1.bf16.msra.mxu0 %v1415_v5  ;;  %v1451_v5 = vld [vmem:[#allocation8 + $0x38] sm:$0xff]  }
 0x101   :  { %917 = vmatprep.subr.bf16.mxu0 %v1420_v6  ;;  %v725_v6 = vld [vmem:[%s1777_s8] sm:$0x3] }
 0x104   :  { %918 = vmatpush1.bf16.msra.mxu0 %v1418_v7  ;;  %v730_v7 = vrot.slane %v725_v6, %v1718_v1  ;;  %v1239_v1 = vld [vmem:[%s1779_s10] ss:$0 sm:$0xff] }
 0x105   :  { %919 = vmatprep.subr.bf16.mxu0 %v1423_v8  ;;  %v734_v8 = vrot.slane %v725_v6, %v1723_v4 }
 0x108   :  { %920 = vmatpush1.bf16.msra.mxu0 %v1421_v9 }
 0x109   :  { %921 = vmatprep.subr.bf16.mxu0 %v1426_v10 }
 0x10c   :  { %922 = vmatpush1.bf16.msra.mxu0 %v1424_v11 }
 0x10d   :  { %923 = vmatprep.subr.bf16.mxu0 %v1429_v12 }
 0x110   :  { %924 = vmatpush1.bf16.msra.mxu0 %v1427_v13 }
 0x111   :  { %925 = vmatprep.subr.bf16.mxu0 %v1432_v31 }
 0x114   :  { %926 = vmatpush1.bf16.msra.mxu0 %v1430_v32 }
 0x115   :  { %927 = vmatprep.subr.bf16.mxu0 %v1435_v33 }
 0x118   :  { %928 = vmatpush1.bf16.msra.mxu0 %v1433_v34 }
 0x1ae   :  { %v425_v17 = vpop.f32.mrb[0].mxu0 }
 0x1af   :  { %v426_v18 = vadd.f32 %v425_v17, %v224_v15  ;;  %v427_v19 = vpop.f32.mrb[1].mxu0 }
 0x1b0   :  { %v428_v20 = vadd.f32 %v427_v19, %v228_v16  ;;  %v429_v21 = vpop.f32.mrb[2].mxu0 }
 0x1b1   :  { %v430_v22 = vadd.f32 %v429_v21, %v224_v15  ;;  %v431_v23 = vpop.f32.mrb[3].mxu0  ;;  %v434_v25 = vmax.f32 %v426_v18, 0.0 }
 0x1b2   :  { %v432_v24 = vadd.f32 %v431_v23, %v228_v16  ;;  %v435_v27 = vmax.f32 %v428_v20, 0.0 }
 0x1b3   :  { %v436_v26 = vmax.f32 %v430_v22, 0.0 }
 0x1b4   :  { %v437_v28 = vmax.f32 %v432_v24, 0.0 }
 0x1b5   :  { %v438_v29 = vpack.c.bf16 %v436_v26, %v434_v25 }
 0x1b6   :  { %v439_v30 = vpack.c.bf16 %v437_v28, %v435_v27 }
 0x1b8   :  { %676 = vmatprep.mubr.bf16.mxu1 %v439_v30 }
 0x1b9   :  { %677 = vmatmul.mubr.bf16.vlgmr.msra.gmra.mrb[0].mxu1 %v438_v29 }
 0x1ba   :  { %1257 = vmatpush3.bf16.msra.mxu1 %v1437_v36 }
 0x1bb   :  { %1258 = vmatprep.subr.bf16.mxu1 %v1438_v37 }
 0x1be   :  { %1259 = vmatpush3.bf16.msra.mxu1 %v1439_v38 }
 0x1bf   :  { %1260 = vmatprep.subr.bf16.mxu1 %v1440_v39 }
 0x1c2   :  { %1261 = vmatpush3.bf16.msra.mxu1 %v1441_v40 }
 0x1c3   :  { %1262 = vmatprep.subr.bf16.mxu1 %v1442_v41 }
 0x1c6   :  { %1263 = vmatpush3.bf16.msra.mxu1 %v1443_v42 }
 0x1c7   :  { %1264 = vmatprep.subr.bf16.mxu1 %v1444_v43 }
 0x1ca   :  { %1265 = vmatpush3.bf16.msra.mxu1 %v1445_v44 }
 0x1cb   :  { %1266 = vmatprep.subr.bf16.mxu1 %v1446_v45 }
 0x1ce   :  { %1267 = vmatpush3.bf16.msra.mxu1 %v1447_v63 }
 0x1cf   :  { %1268 = vmatprep.subr.bf16.mxu1 %v1448_v0 }
 0x1d2   :  { %1269 = vmatpush3.bf16.msra.mxu1 %v1449_v2 }
 0x1d3   :  { %1270 = vmatprep.subr.bf16.mxu1 %v1450_v3 }
 0x1d6   :  { %1271 = vmatpush3.bf16.msra.mxu1 %v1451_v5 }
 0x28c   :  { %v678_v49 = vpop.f32.mrb[0].mxu1 }
 0x28d   :  { %v679_v50 = vadd.f32 %v678_v49, %v477_v47  ;;  %v680_v51 = vpop.f32.mrb[1].mxu1 }
 0x28e   :  { %v681_v52 = vadd.f32 %v680_v51, %v481_v48  ;;  %v682_v53 = vpop.f32.mrb[2].mxu1 }
 0x28f   :  { %v683_v54 = vadd.f32 %v682_v53, %v477_v47  ;;  %v684_v55 = vpop.f32.mrb[3].mxu1  ;;  %v687_v57 = vmax.f32 %v679_v50, 0.0 }
 0x290   :  { %v685_v56 = vadd.f32 %v684_v55, %v481_v48  ;;  %v688_v59 = vmax.f32 %v681_v52, 0.0 }
 0x291   :  { %v689_v58 = vmax.f32 %v683_v54, 0.0 }
 0x292   :  { %v690_v60 = vmax.f32 %v685_v56, 0.0 }
 0x293   :  { %v691_v61 = vpack.c.bf16 %v689_v58, %v687_v57 }
 0x294   :  { %v692_v62 = vpack.c.bf16 %v690_v60, %v688_v59 }
 0x296   :  { %929 = vmatprep.mubr.bf16.mxu0 %v692_v62 }
 0x297   :  { %930 = vmatmul.mubr.bf16.vlgmr.msra.gmra.mrb[4].mxu0 %v691_v61 }
 0x36a   :  { %v931_v9 = vpop.f32.mrb[4].mxu0 }
 0x36b   :  { %v932_v10 = vadd.f32 %v931_v9, %v730_v7  ;;  %v933_v11 = vpop.f32.mrb[5].mxu0 }
 0x36c   :  { %v934_v12 = vadd.f32 %v933_v11, %v734_v8  ;;  %v935_v13 = vpop.f32.mrb[6].mxu0 }
 0x36d   :  { %v936_v14 = vadd.f32 %v935_v13, %v730_v7  ;;  %v937_v15 = vpop.f32.mrb[7].mxu0  ;;  %v940_v17 = vmax.f32 %v932_v10, 0.0 }
 0x36e   :  { %v938_v16 = vadd.f32 %v937_v15, %v734_v8  ;;  %v941_v19 = vmax.f32 %v934_v12, 0.0 }
 0x36f   :  { %v942_v18 = vmax.f32 %v936_v14, 0.0 }
 0x370   :  { %v943_v20 = vmax.f32 %v938_v16, 0.0 }
 0x371   :  { %v944_v21 = vpack.c.bf16 %v942_v18, %v940_v17 }
 0x372   :  { %v945_v22 = vpack.c.bf16 %v943_v20, %v941_v19 }
 0x374   :  { %1113 = vmatprep.mubr.bf16.mxu1 %v945_v22 }
 0x375   :  { %1114 = vmatmul.mubr.bf16.vlgmr.msra.gmra.mrb[4].mxu1 %v944_v21 }
 0x448   :  { %v1272_v23 = vpop.f32.mrb[4].mxu1 }
 0x449   :  { %v1273_v4 = vpop.f32.mrb[5].mxu1 }
 0x44a   :  { %v1274_v24 = vadd.f32 %v1273_v4, %v1272_v23  ;;  %v1275_v25 = vpop.f32.mrb[6].mxu1 }
 0x44b   :  { %v1276_v26 = vpop.f32.mrb[7].mxu1 }
 0x44c   :  { %v1116_v27 = vadd.f32 %v1274_v24, %v1239_v1  ;;  %v1277_v28 = vadd.f32 %v1276_v26, %v1275_v25 }
 0x44e   :  { %1122 = vst [vmem:[#allocation10] sm:$0xff] %v1116_v27  ;;  %v1119_v29 = vadd.f32 %v1277_v28, %v1239_v1 }
 0x450   :  { %1123 = vst [vmem:[#allocation10 + $0x8] sm:$0xff] %v1119_v29 }
 0x451   :  { %1551 = shalt.err (!%p1548_p8)
}
 0x452   :  { %s1552_s24 = scalar_lea.hbm %s1780_s11, 256 }
 0x453   :  { %p1553_p9 = scmp.ne.s32.totalorder %s1780_s11, %s1552_s24  ;;  %p1556_p10 = scmp.lt.u32.totalorder %s1552_s24, %s1780_s11 }
 0x455   :  { %p1558_p11 = pnand %p1556_p10, %p1553_p9 }
 0x457   :  { %1561 = shalt.err (!%p1558_p11)
}
 0x458   :  { %1135 = dma.vmem_to_hbm [thread:$0]  %s1130_s23, 256, %s1780_s11, [#allocation4], %s1572_s29, %s1572_s29, %s1573_s30  }
 0x459   :  { %1568 = dma.done.wait [#allocation4], 256  }
 0x45a   :  { %1569 = vsyncadd [#allocation4], 4294967040 }
 0x45b   :  { %1139 = vsyncpa [#allocation3], 1 }
 0x45c   :  { %1140 = vsyncpa [#allocation6], 1 }
 0x45d   :  { %1141 = vsyncpa [#allocation9], 1 }
 0x45e   :  { %1142 = vsyncpa [#allocation4], 1 }

</bundles_post_ra>
